<compile_context>
chip_gen: v7x
topology: tpu7x:2x2x1
jax: 0.10.0
libtpu: 0.0.40
codegen_flags: <defaults>
</compile_context>

<pallas_src>
import numpy as np

import jax
import jax.numpy as jnp
from jax.experimental import pallas as pl
from jax.experimental.pallas import tpu as pltpu


def _round_up(x, m):
    return ((x + m - 1) // m) * m


def _pad2(a, rows, cols):
    return jnp.pad(a, ((0, rows - a.shape[0]), (0, cols - a.shape[1])))


# --------------------------- kernel 1: XW = X @ W -----------------------------
def _xw_kernel(x_ref, w_ref, o_ref):
    # Tiny dense matmul (bf16 operands, f32 accumulation), once per row tile,
    # hoisted off the adjacency-streaming loop.
    o_ref[...] = jnp.dot(x_ref[...], w_ref[...],
                         preferred_element_type=jnp.float32).astype(o_ref.dtype)


def _dense_xw(x_bf16, w_bf16, *, tm):
    n_pad, f_in = x_bf16.shape
    f_out = w_bf16.shape[1]
    return pl.pallas_call(
        _xw_kernel,
        out_shape=jax.ShapeDtypeStruct((n_pad, f_out), jnp.bfloat16),
        grid_spec=pltpu.PrefetchScalarGridSpec(
            num_scalar_prefetch=0,
            grid=(n_pad // tm,),
            in_specs=[pl.BlockSpec((tm, f_in), lambda i: (i, 0)),
                      pl.BlockSpec((f_in, f_out), lambda i: (0, 0))],
            out_specs=pl.BlockSpec((tm, f_out), lambda i: (i, 0)),
        ),
        compiler_params=pltpu.CompilerParams(
            dimension_semantics=("parallel",),
            vmem_limit_bytes=48 * 1024 * 1024),
    )(x_bf16, w_bf16)


# --------- kernel 2: block-sparse aggregation over nonzero adjacency blocks ----
def _make_agg_kernel(*, xw_resident, tk, apply_relu, apply_dropout, drop_p, fuse_w):
    def kernel(row_ref, col_ref, first_ref, last_ref, seed_ref,
               adj_ref, xw_ref, b_ref, *rest):
        if fuse_w:
            wn_ref, out_ref, acc_ref = rest
        else:
            out_ref, acc_ref = rest

        g = pl.program_id(0)

        @pl.when(first_ref[g] == 1)
        def _():
            acc_ref[...] = jnp.zeros_like(acc_ref)

        if xw_resident:
            # XW stays resident in VMEM (constant block index -> single DMA);
            # pick the column block with a dynamic, tile-aligned slice.
            off = pl.multiple_of(col_ref[g] * tk, tk)
            xw_blk = xw_ref[pl.ds(off, tk), :]
        else:
            xw_blk = xw_ref[...]

        acc_ref[...] += jnp.dot(adj_ref[...], xw_blk,
                                preferred_element_type=jnp.float32)

        @pl.when(last_ref[g] == 1)
        def _():
            h = acc_ref[...] + b_ref[...]
            if apply_relu:
                h = jnp.maximum(h, 0.0)
            if apply_dropout:
                # Inverted dropout; seed mixed with the row-tile id so each row tile
                # draws distinct bits; integer-threshold compare (no u32->f32 cast).
                pltpu.prng_seed(seed_ref[0] + row_ref[g])
                bits = pltpu.bitcast(pltpu.prng_random_bits(h.shape), jnp.uint32)
                thresh = jnp.uint32(min(int(round(drop_p * (2.0 ** 32))), 2 ** 32 - 1))
                h = jnp.where(bits >= thresh, h * (1.0 / (1.0 - drop_p)), 0.0)
            if fuse_w:
                # Fused next-layer transform: hw = act(h) @ W_next (MXU slack,
                # removes a full HBM round-trip of h).
                h = jnp.dot(h.astype(wn_ref.dtype), wn_ref[...],
                            preferred_element_type=jnp.float32)
            out_ref[...] = h.astype(out_ref.dtype)

    return kernel


def _gcn_aggregate(graph, xw_bf16, b_pad, w_next, seed_arr, *,
                   apply_relu, apply_dropout, drop_p, out_dtype):
    adj = graph["adj"]
    n_pad = adj.shape[0]
    tile = graph["tile"]
    num_blocks = graph["num_blocks"]
    width = xw_bf16.shape[1]                       # accumulator width
    fuse_w = w_next is not None
    f_out = w_next.shape[1] if fuse_w else width

    # Keep XW resident in VMEM when it fits a conservative budget (covers
    # double-buffering and leaves headroom on v7x's 64 MiB VMEM).
    xw_resident = (n_pad * width * 2) <= (8 * 1024 * 1024)

    kernel = _make_agg_kernel(xw_resident=xw_resident, tk=tile,
                              apply_relu=apply_relu, apply_dropout=apply_dropout,
                              drop_p=drop_p, fuse_w=fuse_w)

    # index_maps receive the scalar-prefetch refs as trailing positional args.
    adj_map = lambda g, row, col, first, last, seed: (row[g], col[g])
    out_map = lambda g, row, col, first, last, seed: (row[g], 0)
    const_map = lambda g, row, col, first, last, seed: (0, 0)

    adj_kwargs = {}
    if num_blocks >= 3:
        adj_kwargs["pipeline_mode"] = pl.Buffered(3)   # deeper prefetch on large grids
    adj_spec = pl.BlockSpec((tile, tile), adj_map, **adj_kwargs)

    if xw_resident:
        xw_spec = pl.BlockSpec((n_pad, width), const_map)
    else:
        xw_spec = pl.BlockSpec((tile, width),
                               lambda g, row, col, first, last, seed: (col[g], 0))

    in_specs = [adj_spec, xw_spec, pl.BlockSpec((1, width), const_map)]
    inputs = [graph["row_ids"], graph["col_ids"], graph["first"], graph["last"],
              seed_arr, adj, xw_bf16, b_pad]
    if fuse_w:
        in_specs.append(pl.BlockSpec((width, f_out), const_map))
        inputs.append(w_next)

    return pl.pallas_call(
        kernel,
        out_shape=jax.ShapeDtypeStruct((n_pad, f_out), out_dtype),
        grid_spec=pltpu.PrefetchScalarGridSpec(
            num_scalar_prefetch=5,
            grid=(num_blocks,),               # nonzero adjacency blocks only
            in_specs=in_specs,
            out_specs=pl.BlockSpec((tile, f_out), out_map),
            scratch_shapes=[pltpu.VMEM((tile, width), jnp.float32)]),
        compiler_params=pltpu.CompilerParams(
            # Flat block grid: row boundaries are data-dependent -> "arbitrary".
            dimension_semantics=("arbitrary",),
            vmem_limit_bytes=48 * 1024 * 1024),
    )(*inputs)


# ---------------------------- per-graph precompute -----------------------------
def _normalized_adjacency(edge_index, num_nodes):
    """Dense A_hat = D^-1/2 (A + I) D^-1/2 matching PyG gcn_norm (add_self_loops)."""
    src, dst = edge_index[0], edge_index[1]
    a = np.zeros((num_nodes, num_nodes), np.float32)
    np.add.at(a, (dst, src), 1.0)
    a += np.eye(num_nodes, dtype=np.float32)
    deg = a.sum(axis=1)
    dinv = np.where(deg > 0, 1.0 / np.sqrt(deg), 0.0).astype(np.float32)
    return dinv[:, None] * a * dinv[None, :]


def prepare_graph(edge_index, num_nodes, *, tile=512):
    """Build once per graph and cache: padded bf16 A_hat + CSR-of-blocks tables.

    Hoisted out of the forward pass so the O(N^2) construction / block scan is not
    paid on every call.
    TODO(synk): for very large graphs build the block list directly from edge_index
    (never densify) and, on v7x, stream the adjacency as fp8 (e4m3) to halve the
    dominant HBM stream.
    """
    a_hat = _normalized_adjacency(np.asarray(edge_index), num_nodes)

    tile = min(tile, _round_up(num_nodes, 128))
    n_pad = _round_up(num_nodes, tile)
    adj_pad = np.zeros((n_pad, n_pad), np.float32)
    adj_pad[:num_nodes, :num_nodes] = a_hat

    nt = n_pad // tile
    mask = np.any(adj_pad.reshape(nt, tile, nt, tile) != 0, axis=(1, 3))
    rows, cols = np.nonzero(mask)          # row-major: blocks of a row are contiguous
    g = int(rows.size)                     # >= 1 (self-loops keep diagonal blocks nonzero)
    first = np.ones(g, np.int32)
    last = np.ones(g, np.int32)
    if g > 1:
        same = rows[1:] == rows[:-1]
        first[1:] = (~same).astype(np.int32)
        last[:-1] = (~same).astype(np.int32)

    return {
        "adj": jnp.asarray(adj_pad, jnp.bfloat16),
        "row_ids": jnp.asarray(rows.astype(np.int32)),
        "col_ids": jnp.asarray(cols.astype(np.int32)),
        "first": jnp.asarray(first),
        "last": jnp.asarray(last),
        "n_pad": int(n_pad),
        "tile": int(tile),
        "num_blocks": g,
    }


# ------------------------------ forward / params -------------------------------
def gcn_forward(x, graph, params, *, training=False, drop_p=0.3, seed=0):
    n, f_in = x.shape
    w1, b1, w2, b2 = params["w1"], params["b1"], params["w2"], params["b2"]
    hid, f_out = w1.shape[1], w2.shape[1]

    n_pad, tile = graph["n_pad"], graph["tile"]
    fp_in, fp_h, fp_out = (_round_up(d, 128) for d in (f_in, hid, f_out))

    x_pad = _pad2(x, n_pad, fp_in).astype(jnp.bfloat16)
    w1_pad = _pad2(w1, fp_in, fp_h).astype(jnp.bfloat16)
    b1_pad = _pad2(b1.reshape(1, -1), 1, fp_h).astype(jnp.float32)
    w2_pad = _pad2(w2, fp_h, fp_out).astype(jnp.bfloat16)
    b2_pad = _pad2(b2.reshape(1, -1), 1, fp_out).astype(jnp.float32)

    seed_arr = jnp.array([seed], dtype=jnp.int32)

    # layer 1 (+ fused layer-2 transform):
    #   hw2 = dropout(relu(A_hat @ (X W1) + b1)) @ W2     (emitted in bf16)
    xw1 = _dense_xw(x_pad, w1_pad, tm=tile)
    hw2 = _gcn_aggregate(graph, xw1, b1_pad, w2_pad, seed_arr,
                         apply_relu=True, apply_dropout=training,
                         drop_p=drop_p, out_dtype=jnp.bfloat16)

    # layer 2 aggregation: out = A_hat @ hw2 + b2
    out = _gcn_aggregate(graph, hw2, b2_pad, None, seed_arr,
                         apply_relu=False, apply_dropout=False,
                         drop_p=drop_p, out_dtype=jnp.float32)

    return out[:n, :f_out]


def init_params(key, in_channels, hidden_channels, out_channels):
    """Glorot-uniform weights (PyG default), zero biases. Deterministic."""
    k1, k2 = jax.random.split(key)

    def glorot(k, fan_in, fan_out):
        limit = jnp.sqrt(6.0 / (fan_in + fan_out))
        return jax.random.uniform(k, (fan_in, fan_out), jnp.float32, -limit, limit)

    return {
        "w1": glorot(k1, in_channels, hidden_channels),
        "b1": jnp.zeros((1, hidden_channels), jnp.float32),
        "w2": glorot(k2, hidden_channels, out_channels),
        "b2": jnp.zeros((1, out_channels), jnp.float32),
    }


# ------------------------------ reference (pure JAX) ---------------------------
def gcn_reference(x, edge_index, params):
    a_hat = jnp.asarray(_normalized_adjacency(np.asarray(edge_index), x.shape[0]))
    h = a_hat @ (x @ params["w1"]) + params["b1"]
    h = jnp.maximum(h, 0.0)
    # dropout in eval mode: identity
    return a_hat @ (h @ params["w2"]) + params["b2"]


if __name__ == "__main__":
    N, IN_C, HID_C, OUT_C = 16, 4, 32, 8

    key = jax.random.PRNGKey(0)
    k_x, k_p = jax.random.split(key)

    # node features
    x = jax.random.normal(k_x, (N, IN_C), jnp.float32)

    # deterministic small graph: bidirectional ring over N nodes -> edge_index [2, 2N]
    i = np.arange(N, dtype=np.int32)
    src = np.concatenate([i, (i + 1) % N])
    dst = np.concatenate([(i + 1) % N, i])
    edge_index = np.stack([src, dst], axis=0)

    params = init_params(k_p, IN_C, HID_C, OUT_C)

    graph = prepare_graph(edge_index, N)           # build once per graph, reuse
    out = gcn_forward(x, graph, params, training=False)
    out = jax.block_until_ready(out)

    ref = gcn_reference(x, edge_index, params)
    assert out.shape == (N, OUT_C)
    # bf16 matmul operands / bf16 intermediate (f32 accumulation) -> loosened tolerance.
    assert jnp.allclose(out, ref, atol=5e-2, rtol=5e-2), "mismatch vs pure-JAX reference"

    print("KERNEL_OK")
</pallas_src>

<mosaic_0001>
module attributes {stable_mosaic.version = 11 : i64} {
  func.func @_xw_kernel(%arg0: i32, %arg1: memref<128x128xbf16, #tpu.memory_space<vmem>>, %arg2: memref<128x128xbf16, #tpu.memory_space<vmem>>, %arg3: memref<128x128xbf16, #tpu.memory_space<vmem>>) attributes {dimension_semantics = [#tpu.dimension_semantics<parallel>], iteration_bounds = array<i64: 1>, scalar_prefetch = 0 : i64, scratch_operands = 0 : i64, tpu.core_type = #tpu.core_type<tc>, window_params = [{transform_indices = @transform_0, window_bounds = array<i64: 128, 128>}, {pipeline_mode = #tpu.pipeline_mode<synchronous>, transform_indices = @transform_1, window_bounds = array<i64: 128, 128>}, {transform_indices = @transform_2, window_bounds = array<i64: 128, 128>}]} {
    %c0 = arith.constant 0 : index
    %c0_0 = arith.constant 0 : index
    %0 = vector.load %arg1[%c0, %c0_0] : memref<128x128xbf16, #tpu.memory_space<vmem>>, vector<128x128xbf16>
    %c0_1 = arith.constant 0 : index
    %c0_2 = arith.constant 0 : index
    %1 = vector.load %arg2[%c0_1, %c0_2] : memref<128x128xbf16, #tpu.memory_space<vmem>>, vector<128x128xbf16>
    %cst = arith.constant dense<0.000000e+00> : vector<128x128xf32>
    %2 = tpu.matmul %0, %1, %cst {dimension_numbers = #tpu.dot_dimension_numbers<[1], [0], [0], [1], [0, 0, 1, 1], [], []>} : vector<128x128xbf16>, vector<128x128xbf16>, vector<128x128xf32> -> vector<128x128xf32>
    %3 = arith.truncf %2 : vector<128x128xf32> to vector<128x128xbf16>
    %c0_3 = arith.constant 0 : index
    %c0_4 = arith.constant 0 : index
    %4 = vector.load %arg3[%c0_3, %c0_4] : memref<128x128xbf16, #tpu.memory_space<vmem>>, vector<128x128xbf16>
    tpu.vector_store %arg3[%c0_3, %c0_4], %3 {strides = array<i32>} : memref<128x128xbf16, #tpu.memory_space<vmem>>, vector<128x128xbf16>,
    return
  }
  func.func @transform_0(%arg0: i32) -> (i32, i32) {
    %c0_i32 = arith.constant 0 : i32
    %c0_i32_0 = arith.constant 0 : i32
    return %arg0, %c0_i32 : i32, i32
  }
  func.func @transform_1(%arg0: i32) -> (i32, i32) {
    %c0_i32 = arith.constant 0 : i32
    %c0_i32_0 = arith.constant 0 : i32
    %c0_i32_1 = arith.constant 0 : i32
    return %c0_i32, %c0_i32_0 : i32, i32
  }
  func.func @transform_2(%arg0: i32) -> (i32, i32) {
    %c0_i32 = arith.constant 0 : i32
    %c0_i32_0 = arith.constant 0 : i32
    return %arg0, %c0_i32 : i32, i32
  }
}

</mosaic_0001>

<bundles_post_ra>
// kernel: tpu_custom_call.1
= control target key start
LH: loop header
LB: loop body
LE: loop exit
PB: predicated region body
PF: predicated region fallthrough
CT: control target
= control target key end

     0   :  { %7 = vsyncpa [#allocation3], 0  ;;  %s681_s0 = inlined_call_operand.hbm [shape: bf16[128,128], index: 0, kind: input, shape index: {}]   ;;  %s682_s1 = inlined_call_operand.hbm [shape: bf16[128,128], index: 1, kind: input, shape index: {}]   ;;  %s683_s2 = inlined_call_operand.hbm [shape: bf16[128,128], index: 2, kind: output, shape index: {}]  }
   0x1   :  { %8 = vsyncpa [#allocation6], 0 }
   0x2   :  { %9 = vsyncpa [#allocation4], 0  ;;  %s616_s9 = smov [#allocation2]   ;;  %s544_s13 = scalar_lea.hbm %s681_s0, 1024 }
   0x3   :  { %s15_s10 = sshll.u32 %s616_s9, 4  ;;  %p545_p0 = scmp.ne.s32.totalorder %s681_s0, %s544_s13  ;;  %s16_s10 = int_to_ptr.vmem [resolvable:$true] %s15_s10 }
   0x4   :  { %p548_p1 = scmp.lt.u32.totalorder %s544_s13, %s681_s0 }
   0x6   :  { %p550_p2 = pnand %p548_p1, %p545_p0 }
   0x8   :  { %553 = shalt.err (!%p550_p2)
}
   0x9   :  { %s554_s18 = scalar_lea.vmem %s16_s10, 1024  ;;  %p559_p4 = scmp.lt.s32.totalorder %s16_s10, %s16_s10 }
   0xa   :  { %p555_p3 = scmp.ne.s32.totalorder %s16_s10, %s554_s18  ;;  %p560_p5 = scmp.lt.s32.totalorder %s554_s18, %s554_s18 }
   0xc   :  { %p561_p6 = por %p560_p5, %p559_p4 }
   0xe   :  { %p562_p7 = pnand %p561_p6, %p555_p3 }
  0x10   :  { %565 = shalt.err (!%p562_p7)
}
  0x11   :  { %s617_s19 = smov 64   ;;  %s618_s20 = smov 4  }
  0x12   :  { %21 = dma.hbm_to_vmem [thread:$0]  %s681_s0, 1024, %s16_s10, [#allocation3], %s617_s19, %s617_s19, %s618_s20  }
  0x13   :  { %s619_s23 = smov [#allocation5]   ;;  %s566_s27 = scalar_lea.hbm %s682_s1, 1024 }
  0x14   :  { %s27_s24 = sshll.u32 %s619_s23, 4  ;;  %p567_p8 = scmp.ne.s32.totalorder %s682_s1, %s566_s27  ;;  %s28_s24 = int_to_ptr.vmem [resolvable:$true] %s27_s24 }
  0x15   :  { %p570_p9 = scmp.lt.u32.totalorder %s566_s27, %s682_s1 }
  0x17   :  { %p572_p10 = pnand %p570_p9, %p567_p8 }
  0x19   :  { %575 = shalt.err (!%p572_p10)
}
  0x1a   :  { %s576_s4 = scalar_lea.vmem %s28_s24, 1024  ;;  %p581_p12 = scmp.lt.s32.totalorder %s28_s24, %s28_s24 }
  0x1b   :  { %p577_p11 = scmp.ne.s32.totalorder %s28_s24, %s576_s4  ;;  %p582_p13 = scmp.lt.s32.totalorder %s576_s4, %s576_s4 }
  0x1d   :  { %p583_p0 = por %p582_p13, %p581_p12 }
  0x1f   :  { %p584_p1 = pnand %p583_p0, %p577_p11 }
  0x21   :  { %587 = shalt.err (!%p584_p1)
}
  0x22   :  { %33 = dma.hbm_to_vmem [thread:$0]  %s682_s1, 1024, %s28_s24, [#allocation6], %s617_s19, %s617_s19, %s618_s20  }
  0x23   :  { %610 = dma.done.wait [#allocation3], 1024  }
  0x24   :  { %611 = vsyncadd [#allocation3], 4294966272 }
  0x25   :  { %612 = dma.done.wait [#allocation6], 1024  }
  0x26   :  { %613 = vsyncadd [#allocation6], 4294966272  ;;  %v528_v0 = vld [vmem:[#allocation5] sm:$0xff]   ;;  %v529_v1 = vld [vmem:[#allocation5 + $0x8] sm:$0xff]   ;;  %s620_s1 = smov [#allocation7]  }
  0x27   :  { %475 = vmatprep.subr.bf16.mxu0 %v528_v0  ;;  %507 = vmatprep.subr.bf16.mxu1 %v528_v0  ;;  %v530_v2 = vld [vmem:[#allocation5 + $0x10] sm:$0xff]   ;;  %v531_v3 = vld [vmem:[#allocation5 + $0x18] sm:$0xff]   ;;  %v536_v4 = vld [vmem:[#allocation2] sm:$0xff]   ;;  %s351_s6 = sshll.u32 %s620_s1, 4  ;;  %s352_s6 = int_to_ptr.vmem [resolvable:$true] %s351_s6 }
  0x28   :  { %476 = vmatpush3.bf16.msra.mxu0 %v528_v0  ;;  %515 = vmatpush3.bf16.msra.mxu1 %v528_v0  ;;  %v537_v5 = vld [vmem:[#allocation2 + $0x20] sm:$0xff]   ;;  %v533_v7 = vld [vmem:[#allocation5 + $0x28] sm:$0xff]   ;;  %v534_v8 = vld [vmem:[#allocation5 + $0x30] sm:$0xff]   ;;  %s588_s7 = scalar_lea.vmem %s352_s6, 1024  ;;  %p593_p3 = scmp.lt.s32.totalorder %s352_s6, %s352_s6 }
  0x29   :  { %477 = vmatprep.subr.bf16.mxu0 %v529_v1  ;;  %508 = vmatprep.subr.bf16.mxu1 %v529_v1  ;;  %v532_v6 = vld [vmem:[#allocation5 + $0x20] sm:$0xff]   ;;  %v535_v9 = vld [vmem:[#allocation5 + $0x38] sm:$0xff]   ;;  %v538_v10 = vld [vmem:[#allocation2 + $0x8] sm:$0xff]   ;;  %p589_p2 = scmp.ne.s32.totalorder %s352_s6, %s588_s7  ;;  %p594_p4 = scmp.lt.s32.totalorder %s588_s7, %s588_s7 }
  0x2a   :  { %491 = vmatprep.mubr.bf16.mxu0 %v536_v4  ;;  %499 = vmatprep.mubr.bf16.mxu1 %v537_v5  ;;  %v539_v11 = vld [vmem:[#allocation2 + $0x28] sm:$0xff]   ;;  %v540_v12 = vld [vmem:[#allocation2 + $0x10] sm:$0xff]   ;;  %v542_v14 = vld [vmem:[#allocation2 + $0x18] sm:$0xff]  }
  0x2b   :  { %v541_v13 = vld [vmem:[#allocation2 + $0x30] sm:$0xff]   ;;  %v543_v15 = vld [vmem:[#allocation2 + $0x38] sm:$0xff]   ;;  %p595_p5 = por %p594_p4, %p593_p3 }
  0x2c   :  { %478 = vmatpush3.bf16.msra.mxu0 %v529_v1  ;;  %516 = vmatpush3.bf16.msra.mxu1 %v529_v1 }
  0x2d   :  { %479 = vmatprep.subr.bf16.mxu0 %v530_v2  ;;  %509 = vmatprep.subr.bf16.mxu1 %v530_v2  ;;  %p596_p6 = pnand %p595_p5, %p589_p2 }
  0x30   :  { %480 = vmatpush3.bf16.msra.mxu0 %v530_v2  ;;  %517 = vmatpush3.bf16.msra.mxu1 %v530_v2 }
  0x31   :  { %481 = vmatprep.subr.bf16.mxu0 %v531_v3  ;;  %510 = vmatprep.subr.bf16.mxu1 %v531_v3 }
  0x34   :  { %482 = vmatpush3.bf16.msra.mxu0 %v531_v3  ;;  %518 = vmatpush3.bf16.msra.mxu1 %v531_v3 }
  0x35   :  { %483 = vmatprep.subr.bf16.mxu0 %v532_v6  ;;  %511 = vmatprep.subr.bf16.mxu1 %v532_v6 }
  0x38   :  { %484 = vmatpush3.bf16.msra.mxu0 %v532_v6  ;;  %519 = vmatpush3.bf16.msra.mxu1 %v532_v6 }
  0x39   :  { %485 = vmatprep.subr.bf16.mxu0 %v533_v7  ;;  %512 = vmatprep.subr.bf16.mxu1 %v533_v7 }
  0x3c   :  { %486 = vmatpush3.bf16.msra.mxu0 %v533_v7  ;;  %520 = vmatpush3.bf16.msra.mxu1 %v533_v7 }
  0x3d   :  { %487 = vmatprep.subr.bf16.mxu0 %v534_v8  ;;  %513 = vmatprep.subr.bf16.mxu1 %v534_v8 }
  0x40   :  { %488 = vmatpush3.bf16.msra.mxu0 %v534_v8  ;;  %521 = vmatpush3.bf16.msra.mxu1 %v534_v8 }
  0x41   :  { %489 = vmatprep.subr.bf16.mxu0 %v535_v9  ;;  %514 = vmatprep.subr.bf16.mxu1 %v535_v9 }
  0x44   :  { %490 = vmatpush3.bf16.msra.mxu0 %v535_v9  ;;  %522 = vmatpush3.bf16.msra.mxu1 %v535_v9 }
  0x47   :  { %492 = vmatmul.mubr.bf16.vlgmr.msra.gmra.mrb[0].mxu0 %v538_v10  ;;  %500 = vmatmul.mubr.bf16.vlgmr.msra.gmra.mrb[0].mxu1 %v539_v11 }
  0x48   :  { %495 = vmatprep.mubr.bf16.mxu0 %v540_v12  ;;  %503 = vmatprep.mubr.bf16.mxu1 %v541_v13 }
  0x4f   :  { %496 = vmatmul.mubr.bf16.gmra.mrb[4].mxu0 %v542_v14  ;;  %504 = vmatmul.mubr.bf16.gmra.mrb[4].mxu1 %v543_v15 }
 0x11a   :  { %v493_v16 = vpop.f32.mrb[0].mxu0  ;;  %v501_v17 = vpop.f32.mrb[0].mxu1 }
 0x11b   :  { %v203_v18 = vpop.f32.mrb[1].mxu0  ;;  %v235_v19 = vpop.f32.mrb[1].mxu1 }
 0x11c   :  { %v494_v20 = vpop.f32.mrb[2].mxu0  ;;  %v502_v21 = vpop.f32.mrb[2].mxu1 }
 0x11d   :  { %v420_v22 = vpack.c.bf16 %v494_v20, %v493_v16  ;;  %v440_v23 = vpack.c.bf16 %v502_v21, %v501_v17  ;;  %v206_v24 = vpop.f32.mrb[3].mxu0  ;;  %v238_v25 = vpop.f32.mrb[3].mxu1 }
 0x11e   :  { %v415_v26 = vpack.c.bf16 %v206_v24, %v203_v18  ;;  %v435_v27 = vpack.c.bf16 %v238_v25, %v235_v19 }
 0x11f   :  { %452 = vst [vmem:[#allocation7 + $0x8] sm:$0xff] %v420_v22   ;;  %456 = vst [vmem:[#allocation7 + $0x28] sm:$0xff] %v440_v23  }
 0x120   :  { %416 = vst [vmem:[#allocation7] sm:$0xff] %v415_v26   ;;  %455 = vst [vmem:[#allocation7 + $0x20] sm:$0xff] %v435_v27  }
 0x122   :  { %v497_v28 = vpop.f32.mrb[4].mxu0  ;;  %v505_v29 = vpop.f32.mrb[4].mxu1 }
 0x123   :  { %v219_v30 = vpop.f32.mrb[5].mxu0  ;;  %v251_v31 = vpop.f32.mrb[5].mxu1 }
 0x124   :  { %v498_v32 = vpop.f32.mrb[6].mxu0  ;;  %v506_v33 = vpop.f32.mrb[6].mxu1 }
 0x125   :  { %v430_v34 = vpack.c.bf16 %v498_v32, %v497_v28  ;;  %v450_v35 = vpack.c.bf16 %v506_v33, %v505_v29  ;;  %v222_v36 = vpop.f32.mrb[7].mxu0  ;;  %v254_v37 = vpop.f32.mrb[7].mxu1 }
 0x126   :  { %v425_v38 = vpack.c.bf16 %v222_v36, %v219_v30  ;;  %v445_v39 = vpack.c.bf16 %v254_v37, %v251_v31 }
 0x127   :  { %454 = vst [vmem:[#allocation7 + $0x18] sm:$0xff] %v430_v34   ;;  %458 = vst [vmem:[#allocation7 + $0x38] sm:$0xff] %v450_v35  }
 0x128   :  { %453 = vst [vmem:[#allocation7 + $0x10] sm:$0xff] %v425_v38   ;;  %457 = vst [vmem:[#allocation7 + $0x30] sm:$0xff] %v445_v39  }
 0x129   :  { %599 = shalt.err (!%p596_p6)
}
 0x12a   :  { %s600_s10 = scalar_lea.hbm %s683_s2, 1024 }
 0x12b   :  { %p601_p7 = scmp.ne.s32.totalorder %s683_s2, %s600_s10  ;;  %p604_p8 = scmp.lt.u32.totalorder %s600_s10, %s683_s2 }
 0x12d   :  { %p606_p9 = pnand %p604_p8, %p601_p7 }
 0x12f   :  { %609 = shalt.err (!%p606_p9)
}
 0x130   :  { %357 = dma.vmem_to_hbm [thread:$0]  %s352_s6, 1024, %s683_s2, [#allocation4], %s617_s19, %s617_s19, %s618_s20  }
 0x131   :  { %614 = dma.done.wait [#allocation4], 1024  }
 0x132   :  { %615 = vsyncadd [#allocation4], 4294966272 }
 0x133   :  { %361 = vsyncpa [#allocation3], 1 }
 0x134   :  { %362 = vsyncpa [#allocation6], 1 }
 0x135   :  { %363 = vsyncpa [#allocation4], 1 }

</bundles_post_ra>
